<compile_context>
chip_gen: v5e
topology: v5e:2x2
jax: 0.10.0
libtpu: 0.0.40
codegen_flags: <defaults>
</compile_context>

<pallas_src>
import math

import jax
import jax.numpy as jnp
from jax.experimental import pallas as pl
from jax.experimental.pallas import tpu as pltpu

DROPOUT_P = 0.5
INV_SCALE_FACTOR = math.sqrt(1.0 / 128.0)      # matches the PyTorch module
SCALE = 1.0 / INV_SCALE_FACTOR                 # v2 = v1 / inv_scale_factor

# keep = (uniform uint32 bits >= p * 2^32).  We carry the bits as int32 and
# compare against the equivalently-shifted signed threshold (same keep
# probability; avoids unsigned-compare lowering concerns).  Note: this
# constant form only works for 0 < p < 1 (it is exact for p=0.5).
_DROP_THRESHOLD_I32 = int(round(DROPOUT_P * (2.0 ** 32))) - 2 ** 31   # == 0 for p=0.5


def _sdpa_dropout_kernel(x1_ref, x2_ref, x3_ref, bits_ref, o_ref):
    """Single invocation over the whole (small) problem.

    x1_ref   : (B, M, D) f32
    x2_ref   : (B, N, D) f32
    x3_ref   : (B, N, K) f32
    bits_ref : (B, M, N) int32 random bits for the dropout mask
    o_ref    : (B, M, K) f32
    """
    # bf16 operands for the MXU (native single-pass path), f32 accumulation.
    x1 = x1_ref[...].astype(jnp.bfloat16)
    x2 = x2_ref[...].astype(jnp.bfloat16)
    bits = bits_ref[...]

    # scores = (x1 @ x2^T) / inv_scale_factor, contraction on the last dims
    # of both operands (no explicit transpose of x2).
    scores = jnp.einsum("bmd,bnd->bmn", x1, x2,
                        preferred_element_type=jnp.float32)
    scores = scores * jnp.float32(SCALE)

    # numerically-stable softmax over the last dim
    m = jnp.max(scores, axis=-1, keepdims=True)
    e = jnp.exp(scores - m)
    denom = jnp.sum(e, axis=-1, keepdims=True)

    # fold the dropout 1/(1-p) rescale into the softmax normalization;
    # approx=True -> EUP vrcp slot (otherwise idle here).
    inv = pl.reciprocal(denom * jnp.float32(1.0 - DROPOUT_P), approx=True)
    scaled = e * inv

    # dropout keep-mask: one integer compare per element
    # TODO(synk): RNG stream differs from torch's dropout RNG (semantics match).
    keep = bits >= jnp.int32(_DROP_THRESHOLD_I32)
    probs = jnp.where(keep, scaled, jnp.float32(0.0))

    # output = dropout(softmax) @ x3   (bf16 operands, f32 accumulate)
    out = jnp.einsum("bmn,bnk->bmk",
                     probs.astype(jnp.bfloat16),
                     x3_ref[...].astype(jnp.bfloat16),
                     preferred_element_type=jnp.float32)
    o_ref[...] = out.astype(o_ref.dtype)


@jax.jit
def sdpa_dropout(x1, x2, x3, bits):
    B, M, D = x1.shape
    Bn, N, Dn = x2.shape
    Bk, Nk, K = x3.shape
    assert B == Bn == Bk and D == Dn and N == Nk
    assert bits.shape == (B, M, N)

    vmem_spec = pl.BlockSpec(memory_space=pltpu.MemorySpace.VMEM)
    return pl.pallas_call(
        _sdpa_dropout_kernel,
        out_shape=jax.ShapeDtypeStruct((B, M, K), jnp.float32),
        in_specs=[vmem_spec, vmem_spec, vmem_spec, vmem_spec],
        out_specs=vmem_spec,
    )(x1, x2, x3, bits)


def _reference(x1, x2, x3, bits):
    """Pure-JAX reference with the same dropout mask.

    Mirrors the kernel's bf16-operand / f32-accumulate matmul numerics so the
    comparison validates the kernel logic rather than bf16 rounding of the
    (amplified, sqrt(128)-scaled) logits.
    """
    scores = jnp.einsum("bmd,bnd->bmn",
                        x1.astype(jnp.bfloat16), x2.astype(jnp.bfloat16),
                        preferred_element_type=jnp.float32) * jnp.float32(SCALE)
    probs = jax.nn.softmax(scores, axis=-1)
    keep = bits >= jnp.int32(_DROP_THRESHOLD_I32)
    dropped = jnp.where(keep, probs / (1.0 - DROPOUT_P), 0.0)
    return jnp.einsum("bmn,bnk->bmk",
                      dropped.astype(jnp.bfloat16), x3.astype(jnp.bfloat16),
                      preferred_element_type=jnp.float32)


if __name__ == "__main__":
    B, M, D, N, K = 2, 8, 128, 128, 64

    key = jax.random.PRNGKey(0)
    k1, k2, k3, kd = jax.random.split(key, 4)
    x1 = jax.random.normal(k1, (B, M, D), dtype=jnp.float32)
    x2 = jax.random.normal(k2, (B, N, D), dtype=jnp.float32)
    x3 = jax.random.normal(k3, (B, N, K), dtype=jnp.float32)

    # raw uniform bits for the dropout mask (carried as int32, see above)
    bits = jax.lax.bitcast_convert_type(
        jax.random.bits(kd, (B, M, N), dtype=jnp.uint32), jnp.int32)

    out = sdpa_dropout(x1, x2, x3, bits)
    jax.block_until_ready(out)

    # sanity: shape, finiteness, and agreement with a pure-JAX reference
    assert out.shape == (B, M, K)
    assert bool(jnp.all(jnp.isfinite(out)))
    ref = _reference(x1, x2, x3, bits)
    assert bool(jnp.allclose(out, ref, rtol=2e-2, atol=2e-2))

    print("KERNEL_OK")
</pallas_src>

<mosaic_0001>
module attributes {stable_mosaic.version = 11 : i64} {
  func.func @_sdpa_dropout_kernel(%arg0: memref<2x8x128xf32, #tpu.memory_space<vmem>>, %arg1: memref<2x128x128xf32, #tpu.memory_space<vmem>>, %arg2: memref<2x128x64xf32, #tpu.memory_space<vmem>>, %arg3: memref<2x8x128xi32, #tpu.memory_space<vmem>>, %arg4: memref<2x8x64xf32, #tpu.memory_space<vmem>>) attributes {dimension_semantics = [], scalar_prefetch = 0 : i64, scratch_operands = 0 : i64, tpu.core_type = #tpu.core_type<tc>} {
    %c0 = arith.constant 0 : index
    %c0_0 = arith.constant 0 : index
    %c0_1 = arith.constant 0 : index
    %0 = vector.load %arg0[%c0, %c0_0, %c0_1] : memref<2x8x128xf32, #tpu.memory_space<vmem>>, vector<2x8x128xf32>
    %1 = arith.truncf %0 : vector<2x8x128xf32> to vector<2x8x128xbf16>
    %c0_2 = arith.constant 0 : index
    %c0_3 = arith.constant 0 : index
    %c0_4 = arith.constant 0 : index
    %2 = vector.load %arg1[%c0_2, %c0_3, %c0_4] : memref<2x128x128xf32, #tpu.memory_space<vmem>>, vector<2x128x128xf32>
    %3 = arith.truncf %2 : vector<2x128x128xf32> to vector<2x128x128xbf16>
    %c0_5 = arith.constant 0 : index
    %c0_6 = arith.constant 0 : index
    %c0_7 = arith.constant 0 : index
    %4 = vector.load %arg3[%c0_5, %c0_6, %c0_7] : memref<2x8x128xi32, #tpu.memory_space<vmem>>, vector<2x8x128xi32>
    "tpu.trace_start"() <{level = 10 : i32, message = "bmd,bnd->bmn"}> : () -> ()
    %cst = arith.constant dense<0.000000e+00> : vector<2x8x128xf32>
    %5 = tpu.matmul %1, %3, %cst {dimension_numbers = #tpu.dot_dimension_numbers<[2], [2], [1], [1], [0, 0, 0, 1, 1, 1], [0], [0]>} : vector<2x8x128xbf16>, vector<2x128x128xbf16>, vector<2x8x128xf32> -> vector<2x8x128xf32>
    "tpu.trace_stop"() : () -> ()
    %cst_8 = arith.constant 11.3137083 : f32
    %6 = vector.broadcast %cst_8 : f32 to vector<2x8x128xf32>
    %7 = arith.mulf %5, %6 : vector<2x8x128xf32>
    %cst_9 = arith.constant dense<0xFF800000> : vector<2x8xf32>
    %8 = vector.multi_reduction <maximumf>, %7, %cst_9 [2] : vector<2x8x128xf32> to vector<2x8xf32>
    %9 = vector.shape_cast %8 : vector<2x8xf32> to vector<2x8x1xf32>
    %10 = vector.broadcast %9 : vector<2x8x1xf32> to vector<2x8x128xf32>
    %11 = arith.subf %7, %10 : vector<2x8x128xf32>
    %12 = math.exp %11 : vector<2x8x128xf32>
    %cst_10 = arith.constant dense<0.000000e+00> : vector<2x8xf32>
    %13 = vector.multi_reduction <add>, %12, %cst_10 [2] : vector<2x8x128xf32> to vector<2x8xf32>
    %14 = vector.shape_cast %13 : vector<2x8xf32> to vector<2x8x1xf32>
    %cst_11 = arith.constant 5.000000e-01 : f32
    %15 = vector.broadcast %cst_11 : f32 to vector<2x8x1xf32>
    %16 = arith.mulf %14, %15 : vector<2x8x1xf32>
    %17 = tpu.reciprocal %16 {approx = true} : vector<2x8x1xf32> -> vector<2x8x1xf32>
    %18 = vector.broadcast %17 : vector<2x8x1xf32> to vector<2x8x128xf32>
    %19 = arith.mulf %12, %18 : vector<2x8x128xf32>
    %c0_i32 = arith.constant 0 : i32
    %20 = vector.broadcast %c0_i32 : i32 to vector<2x8x128xi32>
    %21 = arith.cmpi sge, %4, %20 : vector<2x8x128xi32>
    %cst_12 = arith.constant 0.000000e+00 : f32
    %22 = vector.broadcast %cst_12 : f32 to vector<2x8x128xf32>
    %23 = arith.select %21, %19, %22 : vector<2x8x128xi1>, vector<2x8x128xf32>
    %24 = arith.truncf %23 : vector<2x8x128xf32> to vector<2x8x128xbf16>
    %c0_13 = arith.constant 0 : index
    %c0_14 = arith.constant 0 : index
    %c0_15 = arith.constant 0 : index
    %25 = vector.load %arg2[%c0_13, %c0_14, %c0_15] : memref<2x128x64xf32, #tpu.memory_space<vmem>>, vector<2x128x64xf32>
    %26 = arith.truncf %25 : vector<2x128x64xf32> to vector<2x128x64xbf16>
    "tpu.trace_start"() <{level = 10 : i32, message = "bmn,bnk->bmk"}> : () -> ()
    %cst_16 = arith.constant dense<0.000000e+00> : vector<2x8x64xf32>
    %27 = tpu.matmul %24, %26, %cst_16 {dimension_numbers = #tpu.dot_dimension_numbers<[2], [1], [1], [2], [0, 0, 0, 1, 1, 2], [0], [0]>} : vector<2x8x128xbf16>, vector<2x128x64xbf16>, vector<2x8x64xf32> -> vector<2x8x64xf32>
    "tpu.trace_stop"() : () -> ()
    %c0_17 = arith.constant 0 : index
    %c0_18 = arith.constant 0 : index
    %c0_19 = arith.constant 0 : index
    %28 = vector.load %arg4[%c0_17, %c0_18, %c0_19] : memref<2x8x64xf32, #tpu.memory_space<vmem>>, vector<2x8x64xf32>
    tpu.vector_store %arg4[%c0_17, %c0_18, %c0_19], %27 {strides = array<i32>} : memref<2x8x64xf32, #tpu.memory_space<vmem>>, vector<2x8x64xf32>,
    return
  }
}

</mosaic_0001>

<bundles_post_ra>
// kernel: sdpa_dropout.1
= control target key start
LH: loop header
LB: loop body
LE: loop exit
PB: predicated region body
PF: predicated region fallthrough
CT: control target
= control target key end

     0   :  { %s739_s0 = inlined_call_operand.vmem [shape: f32[2,8,128], index: 0, kind: input, shape index: {}]   ;;  %s740_s1 = inlined_call_operand.vmem [shape: f32[2,128,128], index: 1, kind: input, shape index: {}]   ;;  %s741_s2 = inlined_call_operand.vmem [shape: f32[2,128,64], index: 2, kind: input, shape index: {}]   ;;  %s742_s3 = inlined_call_operand.vmem [shape: s32[2,8,128], index: 3, kind: input, shape index: {}]   ;;  %s743_s4 = inlined_call_operand.hbm [shape: f32[2,8,64], index: 4, kind: output, shape index: {}]  }
   0x1   :  { %v36_v0 = vld [vmem:[%s740_s1 + $0x70] sm:$0xff]  ;;  %v37_v1 = vld [vmem:[%s740_s1 + $0x78] sm:$0xff]  ;;  %v34_v7 = vld [vmem:[%s740_s1 + $0x60] sm:$0xff] }
   0x2   :  { %v52_v2 = vld [vmem:[%s740_s1 + $0xf0] sm:$0xff]  ;;  %v68_v3 = vpack.c.bf16 %v36_v0, %v36_v0  ;;  %v69_v4 = vpack.c.bf16 %v37_v1, %v37_v1  ;;  %v53_v5 = vld [vmem:[%s740_s1 + $0xf8] sm:$0xff]  ;;  %v35_v8 = vld [vmem:[%s740_s1 + $0x68] sm:$0xff]  ;;  %v66_v10 = vpack.c.bf16 %v34_v7, %v34_v7 }
   0x3   :  { %v84_v6 = vpack.c.bf16 %v52_v2, %v52_v2  ;;  %v85_v9 = vpack.c.bf16 %v53_v5, %v53_v5  ;;  %v50_v11 = vld [vmem:[%s740_s1 + $0xe0] sm:$0xff]  ;;  %v51_v12 = vld [vmem:[%s740_s1 + $0xe8] sm:$0xff]  ;;  %v67_v16 = vpack.c.bf16 %v35_v8, %v35_v8 }
   0x4   :  { %v118_v13 = vunpack.c.l.b16 %v68_v3  ;;  %v119_v14 = vunpack.c.l.b16 %v69_v4  ;;  %v82_v18 = vpack.c.bf16 %v50_v11, %v50_v11  ;;  %v83_v19 = vpack.c.bf16 %v51_v12, %v51_v12 }
   0x5   :  { %v179_v15 = vunpack.c.l.b16 %v84_v6  ;;  %v180_v17 = vunpack.c.l.b16 %v85_v9 }
   0x6   :  { %v127_v20 = vpack.c.b16 %v119_v14, %v118_v13 }
   0x7   :  { %v188_v21 = vpack.c.b16 %v180_v17, %v179_v15 }
   0x8   :  { %9 = vsyncpa [#allocation3], 0  ;;  %136 = vmatpush.bf16.xpose.msra.mxu0 %v127_v20  ;;  %v116_v22 = vunpack.c.l.b16 %v66_v10  ;;  %v117_v23 = vunpack.c.l.b16 %v67_v16  ;;  %v177_v24 = vunpack.c.l.b16 %v82_v18  ;;  %v178_v25 = vunpack.c.l.b16 %v83_v19  ;;  %v32_v26 = vld [vmem:[%s740_s1 + $0x50] sm:$0xff]  ;;  %v33_v27 = vld [vmem:[%s740_s1 + $0x58] sm:$0xff]  ;;  %s488_s14 = smov [#allocation2]   ;;  %s433_s18 = sshll.u32 %s743_s4, 4  ;;  %s434_s18 = int_to_ptr.hbm [resolvable:$true] %s433_s18 }
   0x9   :  { %197 = vmatpush.bf16.xpose.msra.mxu1 %v188_v21  ;;  %v48_v28 = vld [vmem:[%s740_s1 + $0xd0] sm:$0xff]  ;;  %v49_v29 = vld [vmem:[%s740_s1 + $0xd8] sm:$0xff]  ;;  %v64_v31 = vpack.c.bf16 %v32_v26, %v32_v26  ;;  %v65_v32 = vpack.c.bf16 %v33_v27, %v33_v27  ;;  %v30_v40 = vld [vmem:[%s740_s1 + $0x40] sm:$0xff]  ;;  %vm424_vm4 = vcmask 523264   ;;  %s431_s15 = sshll.u32 %s488_s14, 4  ;;  %s490_s19 = smov 8   ;;  %s432_s15 = int_to_ptr.vmem [resolvable:$true] %s431_s15 }
   0xa   :  { %v126_v30 = vpack.c.b16 %v117_v23, %v116_v22  ;;  %v187_v33 = vpack.c.b16 %v178_v25, %v177_v24  ;;  %v80_v34 = vpack.c.bf16 %v48_v28, %v48_v28  ;;  %v81_v35 = vpack.c.bf16 %v49_v29, %v49_v29  ;;  %v31_v41 = vld [vmem:[%s740_s1 + $0x48] sm:$0xff]  ;;  %v46_v42 = vld [vmem:[%s740_s1 + $0xc0] sm:$0xff]  ;;  %v28_v54 = vld [vmem:[%s740_s1 + $0x30] sm:$0xff] }
   0xb   :  { %v114_v36 = vunpack.c.l.b16 %v64_v31  ;;  %v115_v37 = vunpack.c.l.b16 %v65_v32  ;;  %v47_v43 = vld [vmem:[%s740_s1 + $0xc8] sm:$0xff]  ;;  %v62_v45 = vpack.c.bf16 %v30_v40, %v30_v40  ;;  %v63_v46 = vpack.c.bf16 %v31_v41, %v31_v41  ;;  %v29_v55 = vld [vmem:[%s740_s1 + $0x38] sm:$0xff]  ;;  %v44_v56 = vld [vmem:[%s740_s1 + $0xb0] sm:$0xff] }
   0xc   :  { %v175_v38 = vunpack.c.l.b16 %v80_v34  ;;  %v176_v39 = vunpack.c.l.b16 %v81_v35  ;;  %v78_v48 = vpack.c.bf16 %v46_v42, %v46_v42  ;;  %v79_v49 = vpack.c.bf16 %v47_v43, %v47_v43  ;;  %v45_v57 = vld [vmem:[%s740_s1 + $0xb8] sm:$0xff]  ;;  %v26_v4 = vld [vmem:[%s740_s1 + $0x20] sm:$0xff]  ;;  %v27_v5 = vld [vmem:[%s740_s1 + $0x28] sm:$0xff] }
   0xd   :  { %v125_v44 = vpack.c.b16 %v115_v37, %v114_v36  ;;  %v112_v50 = vunpack.c.l.b16 %v62_v45  ;;  %v113_v51 = vunpack.c.l.b16 %v63_v46  ;;  %v60_v59 = vpack.c.bf16 %v28_v54, %v28_v54  ;;  %v42_v6 = vld [vmem:[%s740_s1 + $0xa0] sm:$0xff]  ;;  %v43_v7 = vld [vmem:[%s740_s1 + $0xa8] sm:$0xff]  ;;  %v24_v18 = vld [vmem:[%s740_s1 + $0x10] sm:$0xff] }
   0xe   :  { %v186_v47 = vpack.c.b16 %v176_v39, %v175_v38  ;;  %v173_v52 = vunpack.c.l.b16 %v78_v48  ;;  %v174_v53 = vunpack.c.l.b16 %v79_v49  ;;  %v61_v60 = vpack.c.bf16 %v29_v55, %v29_v55  ;;  %v25_v19 = vld [vmem:[%s740_s1 + $0x18] sm:$0xff]  ;;  %v40_v20 = vld [vmem:[%s740_s1 + $0x90] sm:$0xff]  ;;  %v22_v32 = vld [vmem:[%s740_s1] sm:$0xff] }
   0xf   :  { %v124_v58 = vpack.c.b16 %v113_v51, %v112_v50  ;;  %v76_v62 = vpack.c.bf16 %v44_v56, %v44_v56  ;;  %v77_v63 = vpack.c.bf16 %v45_v57, %v45_v57  ;;  %v110_v0 = vunpack.c.l.b16 %v60_v59  ;;  %v41_v21 = vld [vmem:[%s740_s1 + $0x98] sm:$0xff]  ;;  %v38_v34 = vld [vmem:[%s740_s1 + $0x80] sm:$0xff]  ;;  %v39_v35 = vld [vmem:[%s740_s1 + $0x88] sm:$0xff] }
  0x10   :  { %137 = vmatpush.bf16.xpose.msra.mxu0 %v126_v30  ;;  %v185_v61 = vpack.c.b16 %v174_v53, %v173_v52  ;;  %v111_v1 = vunpack.c.l.b16 %v61_v60  ;;  %v58_v9 = vpack.c.bf16 %v26_v4, %v26_v4  ;;  %v59_v10 = vpack.c.bf16 %v27_v5, %v27_v5  ;;  %v18_v48 = vld [vmem:[%s739_s0] sm:$0xff]  ;;  %v19_v49 = vld [vmem:[%s739_s0 + $0x8] sm:$0xff]  ;;  %v253_v59 = vld [vmem:[%s741_s2 + $0x78] sm:$0xff] }
  0x11   :  { %198 = vmatpush.bf16.xpose.msra.mxu1 %v187_v33  ;;  %v171_v2 = vunpack.c.l.b16 %v76_v62  ;;  %v172_v3 = vunpack.c.l.b16 %v77_v63  ;;  %v74_v12 = vpack.c.bf16 %v42_v6, %v42_v6  ;;  %v75_v13 = vpack.c.bf16 %v43_v7, %v43_v7  ;;  %v23_v33 = vld [vmem:[%s740_s1 + $0x8] sm:$0xff]  ;;  %v250_v60 = vld [vmem:[%s741_s2 + $0x60] sm:$0xff]  ;;  %v268_v6 = vld [vmem:[%s741_s2 + $0xf0] sm:$0xff] }
  0x12   :  { %v123_v8 = vpack.c.b16 %v111_v1, %v110_v0  ;;  %v108_v14 = vunpack.c.l.b16 %v58_v9  ;;  %v109_v15 = vunpack.c.l.b16 %v59_v10  ;;  %v56_v23 = vpack.c.bf16 %v24_v18, %v24_v18  ;;  %v251_v63 = vld [vmem:[%s741_s2 + $0x68] sm:$0xff]  ;;  %v248_v1 = vld [vmem:[%s741_s2 + $0x50] sm:$0xff]  ;;  %v269_v7 = vld [vmem:[%s741_s2 + $0xf8] sm:$0xff] }
  0x13   :  { %v184_v11 = vpack.c.b16 %v172_v3, %v171_v2  ;;  %v169_v16 = vunpack.c.l.b16 %v74_v12  ;;  %v170_v17 = vunpack.c.l.b16 %v75_v13  ;;  %v57_v24 = vpack.c.bf16 %v25_v19, %v25_v19  ;;  %v249_v2 = vld [vmem:[%s741_s2 + $0x58] sm:$0xff]  ;;  %v246_v12 = vld [vmem:[%s741_s2 + $0x40] sm:$0xff]  ;;  %v247_v13 = vld [vmem:[%s741_s2 + $0x48] sm:$0xff] }
  0x14   :  { %v122_v22 = vpack.c.b16 %v109_v15, %v108_v14  ;;  %v72_v26 = vpack.c.bf16 %v40_v20, %v40_v20  ;;  %v73_v27 = vpack.c.bf16 %v41_v21, %v41_v21  ;;  %v106_v28 = vunpack.c.l.b16 %v56_v23  ;;  %v266_v14 = vld [vmem:[%s741_s2 + $0xe0] sm:$0xff] }
  0x15   :  { %v183_v25 = vpack.c.b16 %v170_v17, %v169_v16  ;;  %v107_v29 = vunpack.c.l.b16 %v57_v24  ;;  %v54_v37 = vpack.c.bf16 %v22_v32, %v22_v32  ;;  %v55_v38 = vpack.c.bf16 %v23_v33, %v23_v33  ;;  %v267_v17 = vld [vmem:[%s741_s2 + $0xe8] sm:$0xff]  ;;  %v244_v32 = vld [vmem:[%s741_s2 + $0x30] sm:$0xff]  ;;  %v245_v33 = vld [vmem:[%s741_s2 + $0x38] sm:$0xff] }
  0x16   :  { %v167_v30 = vunpack.c.l.b16 %v72_v26  ;;  %v168_v31 = vunpack.c.l.b16 %v73_v27  ;;  %v70_v40 = vpack.c.bf16 %v38_v34, %v38_v34  ;;  %v71_v41 = vpack.c.bf16 %v39_v35, %v39_v35  ;;  %v265_v27 = vld [vmem:[%s741_s2 + $0xd8] sm:$0xff] }
  0x17   :  { %v121_v36 = vpack.c.b16 %v107_v29, %v106_v28  ;;  %v104_v42 = vunpack.c.l.b16 %v54_v37  ;;  %v105_v43 = vunpack.c.l.b16 %v55_v38  ;;  %v20_v50 = vpack.c.bf16 %v18_v48, %v18_v48 }
  0x18   :  { %138 = vmatpush.bf16.xpose.msra.mxu0 %v125_v44  ;;  %v182_v39 = vpack.c.b16 %v168_v31, %v167_v30  ;;  %v165_v44 = vunpack.c.l.b16 %v70_v40  ;;  %v166_v45 = vunpack.c.l.b16 %v71_v41  ;;  %v21_v51 = vpack.c.bf16 %v19_v49, %v19_v49 }
  0x19   :  { %199 = vmatpush.bf16.xpose.msra.mxu1 %v186_v47  ;;  %v120_v46 = vpack.c.b16 %v105_v43, %v104_v42  ;;  %v285_v62 = vpack.c.bf16 %v253_v59, %v253_v59  ;;  %v282_v0 = vpack.c.bf16 %v250_v60, %v250_v60  ;;  %v283_v3 = vpack.c.bf16 %v251_v63, %v251_v63  ;;  %v242_v59 = vld [vmem:[%s741_s2 + $0x20] sm:$0xff]  ;;  %v243_v60 = vld [vmem:[%s741_s2 + $0x28] sm:$0xff] }
  0x1a   :  { %v181_v47 = vpack.c.b16 %v166_v45, %v165_v44  ;;  %v280_v4 = vpack.c.bf16 %v248_v1, %v248_v1  ;;  %v281_v5 = vpack.c.bf16 %v249_v2, %v249_v2  ;;  %v301_v16 = vpack.c.bf16 %v269_v7, %v269_v7  ;;  %v263_v63 = vld [vmem:[%s741_s2 + $0xc8] sm:$0xff]  ;;  %v241_v7 = vld [vmem:[%s741_s2 + $0x18] sm:$0xff] }
  0x1b   :  { %v333_v9 = vunpack.c.l.b16 %v285_v62  ;;  %v330_v10 = vunpack.c.l.b16 %v282_v0  ;;  %v331_v15 = vunpack.c.l.b16 %v283_v3  ;;  %v278_v24 = vpack.c.bf16 %v246_v12, %v246_v12  ;;  %v261_v12 = vld [vmem:[%s741_s2 + $0xb8] sm:$0xff] }
  0x1c   :  { %v328_v19 = vunpack.c.l.b16 %v280_v4  ;;  %v329_v20 = vunpack.c.l.b16 %v281_v5  ;;  %v394_v23 = vunpack.c.l.b16 %v301_v16  ;;  %v298_v26 = vpack.c.bf16 %v266_v14, %v266_v14 }
  0x1d   :  { %v340_v28 = vpack.c.b16 %v331_v15, %v330_v10  ;;  %v299_v29 = vpack.c.bf16 %v267_v17, %v267_v17  ;;  %v326_v38 = vunpack.c.l.b16 %v278_v24  ;;  %v276_v42 = vpack.c.bf16 %v244_v32, %v244_v32 }
  0x1e   :  { %v391_v31 = vunpack.c.l.b16 %v298_v26  ;;  %v339_v37 = vpack.c.b16 %v329_v20, %v328_v19  ;;  %v277_v43 = vpack.c.bf16 %v245_v33, %v245_v33  ;;  %v275_v62 = vpack.c.bf16 %v243_v60, %v243_v60  ;;  %v238_v20 = vld [vmem:[%s741_s2] sm:$0xff]  ;;  %v259_v26 = vld [vmem:[%s741_s2 + $0xa8] sm:$0xff] }
  0x1f   :  { %v392_v35 = vunpack.c.l.b16 %v299_v29  ;;  %v295_v1 = vpack.c.bf16 %v263_v63, %v263_v63  ;;  %v293_v15 = vpack.c.bf16 %v261_v12, %v261_v12  ;;  %v270_v24 = vpack.c.bf16 %v238_v20, %v238_v20 }
  0x20   :  { %139 = vmatpush.bf16.xpose.msra.mxu0 %v124_v58  ;;  %v252_v58 = vld [vmem:[%s741_s2 + $0x70] sm:$0xff]  ;;  %v323_v3 = vunpack.c.l.b16 %v275_v62  ;;  %v291_v29 = vpack.c.bf16 %v259_v26, %v259_v26 }
  0x21   :  { %200 = vmatpush.bf16.xpose.msra.mxu1 %v185_v61  ;;  %v284_v61 = vpack.c.bf16 %v252_v58, %v252_v58  ;;  %v401_v41 = vpack.c.b16 %v392_v35, %v391_v31  ;;  %v388_v5 = vunpack.c.l.b16 %v295_v1  ;;  %v386_v19 = vunpack.c.l.b16 %v293_v15  ;;  %v257_v35 = vld [vmem:[%s741_s2 + $0x98] sm:$0xff] }
  0x22   :  { %v384_v33 = vunpack.c.l.b16 %v291_v29 }
  0x28   :  { %140 = vmatpush.bf16.xpose.msra.mxu0 %v123_v8  ;;  %v332_v8 = vunpack.c.l.b16 %v284_v61  ;;  %v274_v61 = vpack.c.bf16 %v242_v59, %v242_v59 }
  0x29   :  { %201 = vmatpush.bf16.xpose.msra.mxu1 %v184_v11  ;;  %v300_v11 = vpack.c.bf16 %v268_v6, %v268_v6  ;;  %v240_v6 = vld [vmem:[%s741_s2 + $0x10] sm:$0xff] }
  0x2a   :  { %v341_v18 = vpack.c.b16 %v333_v9, %v332_v8  ;;  %v322_v2 = vunpack.c.l.b16 %v274_v61  ;;  %v260_v8 = vld [vmem:[%s741_s2 + $0xb0] sm:$0xff]  ;;  %v272_v10 = vpack.c.bf16 %v240_v6, %v240_v6 }
  0x2b   :  { %v393_v21 = vunpack.c.l.b16 %v300_v11  ;;  %v273_v11 = vpack.c.bf16 %v241_v7, %v241_v7 }
  0x2c   :  { %350 = vmatpush.bf16.msra.mxu2 %v341_v18  ;;  %v336_v9 = vpack.c.b16 %v323_v3, %v322_v2  ;;  %v320_v16 = vunpack.c.l.b16 %v272_v10 }
  0x2d   :  { %v402_v30 = vpack.c.b16 %v394_v23, %v393_v21  ;;  %v321_v17 = vunpack.c.l.b16 %v273_v11  ;;  %v239_v21 = vld [vmem:[%s741_s2 + $0x8] sm:$0xff] }
  0x2f   :  { %411 = vmatpush.bf16.msra.mxu3 %v402_v30  ;;  %v335_v23 = vpack.c.b16 %v321_v17, %v320_v16  ;;  %v318_v30 = vunpack.c.l.b16 %v270_v24 }
  0x30   :  { %141 = vmatpush.bf16.xpose.msra.mxu0 %v122_v22  ;;  %v264_v22 = vld [vmem:[%s741_s2 + $0xd0] sm:$0xff]  ;;  %351 = vmatpush.bf16.msra.mxu2 %v340_v28 }
  0x31   :  { %202 = vmatpush.bf16.xpose.msra.mxu1 %v183_v25  ;;  %v279_v25 = vpack.c.bf16 %v247_v13, %v247_v13  ;;  %v296_v34 = vpack.c.bf16 %v264_v22, %v264_v22  ;;  %v292_v13 = vpack.c.bf16 %v260_v8, %v260_v8  ;;  %v258_v22 = vld [vmem:[%s741_s2 + $0xa0] sm:$0xff] }
  0x33   :  { %v389_v40 = vunpack.c.l.b16 %v296_v34  ;;  %412 = vmatpush.bf16.msra.mxu3 %v401_v41  ;;  %v385_v18 = vunpack.c.l.b16 %v292_v13  ;;  %v256_v34 = vld [vmem:[%s741_s2 + $0x90] sm:$0xff] }
  0x34   :  { %352 = vmatpush.bf16.msra.mxu2 %v339_v37  ;;  %v288_v37 = vpack.c.bf16 %v256_v34, %v256_v34 }
  0x35   :  { %v398_v28 = vpack.c.b16 %v386_v19, %v385_v18 }
  0x38   :  { %142 = vmatpush.bf16.xpose.msra.mxu0 %v121_v36  ;;  %v297_v36 = vpack.c.bf16 %v265_v27, %v265_v27  ;;  %v290_v27 = vpack.c.bf16 %v258_v22, %v258_v22 }
  0x39   :  { %203 = vmatpush.bf16.xpose.msra.mxu1 %v182_v39  ;;  %v327_v39 = vunpack.c.l.b16 %v279_v25  ;;  %v271_v25 = vpack.c.bf16 %v239_v21, %v239_v21 }
  0x3a   :  { %v390_v44 = vunpack.c.l.b16 %v297_v36  ;;  %v383_v32 = vunpack.c.l.b16 %v290_v27 }
  0x3b   :  { %v338_v49 = vpack.c.b16 %v327_v39, %v326_v38  ;;  %v319_v31 = vunpack.c.l.b16 %v271_v25  ;;  %v289_v38 = vpack.c.bf16 %v257_v35, %v257_v35 }
  0x3c   :  { %v397_v39 = vpack.c.b16 %v384_v33, %v383_v32 }
  0x3d   :  { %353 = vmatpush.bf16.msra.mxu2 %v338_v49  ;;  %v334_v36 = vpack.c.b16 %v319_v31, %v318_v30  ;;  %v382_v41 = vunpack.c.l.b16 %v289_v38 }
  0x40   :  { %143 = vmatpush.bf16.xpose.msra.mxu0 %v120_v46 }
  0x41   :  { %204 = vmatpush.bf16.xpose.msra.mxu1 %v181_v47  ;;  %v400_v47 = vpack.c.b16 %v390_v44, %v389_v40  ;;  %v381_v40 = vunpack.c.l.b16 %v288_v37 }
  0x43   :  { %413 = vmatpush.bf16.msra.mxu3 %v400_v47  ;;  %v396_v44 = vpack.c.b16 %v382_v41, %v381_v40 }
  0x47   :  { %144 = vmatmul.bf16.vlgmr.msra.gmra.mxu0 %v20_v50  ;;  %v324_v50 = vunpack.c.l.b16 %v276_v42  ;;  %v254_v42 = vld [vmem:[%s741_s2 + $0x80] sm:$0xff] }
  0x48   :  { %205 = vmatmul.bf16.vlgmr.msra.gmra.mxu1 %v21_v51  ;;  %v325_v51 = vunpack.c.l.b16 %v277_v43  ;;  %v255_v43 = vld [vmem:[%s741_s2 + $0x88] sm:$0xff] }
  0xc4   :  { %v145_v52 = vpop.f32.mrf.mxu0 }
  0xc5   :  { %v618_v53 = vmul.f32 11.313708, %v145_v52  ;;  %v206_v54 = vpop.f32.mrf.mxu1  ;;  %v337_v52 = vpack.c.b16 %v325_v51, %v324_v50 }
  0xc6   :  { %v621_v55 = vmul.f32 11.313708, %v206_v54 }
  0xc7   :  { %212 = vmax.xlane.f32.xlu0 %v618_v53  ;;  %354 = vmatpush.bf16.msra.mxu2 %v337_v52  ;;  %v86_v52 = vld [vmem:[%s742_s3] sm:$0xff] }
  0xc8   :  { %vm232_vm0 = vcmp.ge.s32.totalorder %v86_v52, 0 }
  0xc9   :  { %vm445_vm1 = vmpackc.low %vm232_vm0, %vm232_vm0 }
  0xcb   :  { %355 = vmatpush.bf16.msra.mxu2 %v336_v9 }
  0xcc   :  { %v147_v56 = vpop.f32.mrf.mxu0 }
  0xcd   :  { %v208_v57 = vpop.f32.mrf.mxu1 }
  0xcf   :  { %214 = vmax.xlane.f32.xlu0 %v621_v55  ;;  %356 = vmatpush.bf16.msra.mxu2 %v335_v23 }
  0xd3   :  { %357 = vmatpush.bf16.msra.mxu2 %v334_v36 }
 0x13a   :  { %v213_v45 = vpop.xlane.xlu0 %212 }
 0x13b   :  { %v216_v46 = vsub.f32 %v618_v53, %v213_v45  ;;  %v286_v45 = vpack.c.bf16 %v254_v42, %v254_v42 }
 0x13d   :  { %v218_v48 = vmul.f32 1.442695, %v216_v46  ;;  %v287_v46 = vpack.c.bf16 %v255_v43, %v255_v43  ;;  %v379_v47 = vunpack.c.l.b16 %v286_v45 }
 0x13f   :  { %454 = vpow2.f32 %v218_v48  ;;  %v380_v48 = vunpack.c.l.b16 %v287_v46 }
 0x141   :  { %v395_v49 = vpack.c.b16 %v380_v48, %v379_v47 }
 0x142   :  { %v215_v54 = vpop.xlane.xlu0 %214 }
 0x143   :  { %v217_v56 = vsub.f32 %v621_v55, %v215_v54  ;;  %v262_v55 = vld [vmem:[%s741_s2 + $0xc0] sm:$0xff] }
 0x144   :  { %v294_v0 = vpack.c.bf16 %v262_v55, %v262_v55  ;;  %v87_v55 = vld [vmem:[%s742_s3 + $0x8] sm:$0xff]  ;;  %s489_s3 = smov 128  }
 0x145   :  { %v674_v57 = vpop.eup %454  ;;  %v220_v58 = vmul.f32 1.442695, %v217_v56  ;;  %vm233_vm2 = vcmp.ge.s32.totalorder %v87_v55, 0 }
 0x146   :  { %222 = vadd.xlane.f32.xlu1 %v674_v57  ;;  %v387_v4 = vunpack.c.l.b16 %v294_v0  ;;  %vm448_vm3 = vmpackc.low %vm233_vm2, %vm233_vm2 }
 0x147   :  { %456 = vpow2.f32 %v220_v58 }
 0x148   :  { %v399_v14 = vpack.c.b16 %v388_v5, %v387_v4 }
 0x14a   :  { %414 = vmatpush.bf16.msra.mxu3 %v399_v14 }
 0x14d   :  { %v677_v53 = vpop.eup %456 }
 0x14e   :  { %224 = vadd.xlane.f32.xlu1 %v677_v53  ;;  %415 = vmatpush.bf16.msra.mxu3 %v398_v28 }
 0x152   :  { %416 = vmatpush.bf16.msra.mxu3 %v397_v39 }
 0x156   :  { %417 = vmatpush.bf16.msra.mxu3 %v396_v44 }
 0x15a   :  { %418 = vmatpush.bf16.msra.mxu3 %v395_v49 }
 0x1b9   :  { %v223_v50 = vpop.xlane.xlu1 %222 }
 0x1ba   :  { %v226_v51 = vmul.f32 0.5, %v223_v50 }
 0x1bc   :  { %458 = vrcp.f32 %v226_v51 }
 0x1c1   :  { %v225_v54 = vpop.xlane.xlu1 %224 }
 0x1c2   :  { %v459_v56 = vpop.eup %458  ;;  %v227_v58 = vmul.f32 0.5, %v225_v54 }
 0x1c3   :  { %v230_v59 = vmul.f32 %v459_v56, %v674_v57 }
 0x1c4   :  { %460 = vrcp.f32 %v227_v58 }
 0x1c5   :  { %v446_v60 = vpack.c.bf16 %v230_v59, %v230_v59 }
 0x1c7   :  { %447 = vmatmul.msk.bf16.vlgmr.msra.gmra.mxu2 %vm445_vm1, %v446_v60 }
 0x1ca   :  { %v461_v61 = vpop.eup %460 }
 0x1cb   :  { %v231_v62 = vmul.f32 %v461_v61, %v677_v53 }
 0x1cd   :  { %v449_v63 = vpack.c.bf16 %v231_v62, %v231_v62 }
 0x1cf   :  { %450 = vmatmul.msk.bf16.vlgmr.msra.gmra.mxu3 %vm448_vm3, %v449_v63 }
 0x24a   :  { %v359_v0 = vpop.f32.mrf.mxu2 }
 0x24b   :  { %425 = vst.msk [vmem:[#allocation2] sm:$0xff] %vm424_vm4, %v359_v0 }
 0x252   :  { %v361_v57 = vpop.f32.mrf.mxu2  ;;  %v420_v1 = vpop.f32.mrf.mxu3 }
 0x253   :  { %426 = vst.msk [vmem:[#allocation2 + $0x8] sm:$0xff] %vm424_vm4, %v420_v1 }
 0x254   :  { %439 = dma.vmem_to_hbm [thread:$0]  %s432_s15, 256, %s434_s18, [#allocation3], %s489_s3, %s489_s3, %s490_s19  }
 0x25a   :  { %v422_v53 = vpop.f32.mrf.mxu3 }
 0x25b   :  { %486 = dma.done.wait [#allocation3], 256  }
 0x25c   :  { %487 = vsyncadd [#allocation3], 4294967040 }
 0x25d   :  { %444 = vsyncpa [#allocation3], 1 }

</bundles_post_ra>
